<compile_context>
chip_gen: v6e
topology: v6e:2x2x1
jax: 0.10.0
libtpu: 0.0.40
codegen_flags: <defaults>
</compile_context>

<pallas_src>
import jax
import jax.numpy as jnp
from jax.experimental import pallas as pl
from jax.experimental.pallas import tpu as pltpu


def _nn_kernel(x_ref, w1_ref, b1_ref, w2_ref, b2_ref, o_ref):
    # ----- per-tile cast (f32 -> bf16) feeding the MXU; no wrapper pass ------
    x = x_ref[...].astype(jnp.bfloat16)

    # ----- Linear 1: (tb, n) @ (n, n_mid) on the MXU, bf16 in / f32 acc ------
    h = jnp.dot(x, w1_ref[...], preferred_element_type=jnp.float32)
    h = h + b1_ref[...]                                   # (tb, n_mid) f32

    # ----- LeakyReLU (PyTorch default negative_slope = 0.01) -----------------
    h = jnp.where(h > 0, h, 0.01 * h)

    # ----- Dropout: identity in inference mode --------------------------------
    # TODO(synk): training-mode dropout (stateful PRNG mask + 1/(1-p) scale)
    # is not implemented.

    # ----- Linear 2 with n_out == 1: VPU multiply + cross-lane reduce --------
    z = jnp.sum(h * w2_ref[...], axis=-1, keepdims=True) + b2_ref[...]  # (tb, 1)

    # ----- Sigmoid: stable form, single EUP reciprocal ------------------------
    ez = jnp.exp(-jnp.abs(z))
    inv = pl.reciprocal(1.0 + ez, approx=True)
    sig = jnp.where(z >= 0, 1.0, ez) * inv
    o_ref[...] = sig.astype(o_ref.dtype)


def prepare_params(w1, b1, w2, b2):
    """One-time parameter preparation (do NOT call per forward).

    w1: (n, n_mid)  -> bf16 (MXU operand)
    b1: (n_mid,)    -> (1, n_mid) f32
    w2: (n_mid, 1)  -> (1, n_mid) f32 row (degenerate matmul done on the VPU)
    b2: (1,)        -> (1, 1) f32
    """
    n, n_mid = w1.shape
    n_out = w2.shape[1]
    assert n_out == 1, "kernel is specialized to the n_out == 1 (Sigmoid) path"
    # TODO(synk): n_out > 1 (Softmax scoring) path not implemented.
    w1_bf = jnp.asarray(w1, jnp.bfloat16)
    b1_2d = jnp.asarray(b1, jnp.float32).reshape(1, n_mid)
    w2_row = jnp.asarray(w2, jnp.float32).reshape(1, n_mid)
    b2_2d = jnp.asarray(b2, jnp.float32).reshape(1, 1)
    return w1_bf, b1_2d, w2_row, b2_2d


def _pick_batch_tile(B):
    # Largest tile <= 512 that divides B while keeping >= 4 grid steps
    # (>= 2 steps per TensorCore on v7x so the x-tile DMA is pipelined).
    candidates = (512, 256, 128, 64, 32, 16, 8)
    tb = next((c for c in candidates if B % c == 0 and B // c >= 4), None)
    if tb is None:
        tb = next((c for c in candidates if B % c == 0 and B // c >= 2), None)
    if tb is None:
        # Non-multiple-of-8 B falls back to a single full-batch block (legal,
        # but inefficient layout; pad B upstream if this matters).
        tb = next((c for c in candidates if B % c == 0), B)
    return tb


def _default_vmem_limit(tb, n, n_mid, x_itemsize):
    x_buf = 2 * tb * n * x_itemsize          # x tile, double-buffered (f32 in-kernel)
    w1_buf = n * n_mid * 2                   # bf16 W1, single-buffered
    vec_buf = 4 * n_mid * 4 + 256            # b1 / w2 row / misc
    out_buf = 2 * tb * 4                     # output column, double-buffered
    temps = 2 * tb * n_mid * 4               # f32 h and elementwise product
    total = x_buf + w1_buf + vec_buf + out_buf + temps
    limit = int(total * 1.25) + (2 << 20)    # headroom
    return min(max(limit, 16 << 20), 48 << 20)


def nn_forward(x, params, *, tb=None, vmem_limit_bytes=None):
    """Forward pass of NN.

    x      : (B, n) float32 (cast to bf16 per-tile inside the kernel)
    params : output of prepare_params()
    Returns (B, 1) float32 probabilities.
    """
    w1_bf, b1_2d, w2_row, b2_2d = params
    B, n = x.shape
    n_w, n_mid = w1_bf.shape
    assert n_w == n, f"x feature dim {n} != W1 input dim {n_w}"
    n_out = 1

    if tb is None:
        tb = _pick_batch_tile(B)
    assert B % tb == 0, f"batch {B} must be divisible by tile {tb}"

    if vmem_limit_bytes is None:
        vmem_limit_bytes = _default_vmem_limit(tb, n, n_mid, x.dtype.itemsize)

    weight_mode = pl.Buffered(1)   # grid-invariant blocks: no double-buffering

    grid_spec = pltpu.PrefetchScalarGridSpec(
        num_scalar_prefetch=0,
        grid=(B // tb,),
        in_specs=[
            pl.BlockSpec((tb, n), lambda i: (i, 0)),                  # x tile
            pl.BlockSpec((n, n_mid), lambda i: (0, 0),
                         pipeline_mode=weight_mode),                  # W1 (bf16, full)
            pl.BlockSpec((1, n_mid), lambda i: (0, 0),
                         pipeline_mode=weight_mode),                  # b1
            pl.BlockSpec((1, n_mid), lambda i: (0, 0),
                         pipeline_mode=weight_mode),                  # w2 row
            pl.BlockSpec((1, 1), lambda i: (0, 0),
                         pipeline_mode=weight_mode),                  # b2
        ],
        out_specs=pl.BlockSpec((tb, n_out), lambda i: (i, 0)),
    )

    cost = pl.CostEstimate(
        flops=2 * B * n * n_mid + 3 * B * n_mid,
        transcendentals=B,
        bytes_accessed=(x.size * x.dtype.itemsize
                        + w1_bf.size * w1_bf.dtype.itemsize
                        + (2 * n_mid + 2) * 4
                        + B * n_out * 4),
    )

    return pl.pallas_call(
        _nn_kernel,
        out_shape=jax.ShapeDtypeStruct((B, n_out), jnp.float32),
        grid_spec=grid_spec,
        compiler_params=pltpu.CompilerParams(
            dimension_semantics=("parallel",),
            vmem_limit_bytes=vmem_limit_bytes,
        ),
        cost_estimate=cost,
    )(x, w1_bf, b1_2d, w2_row, b2_2d)


def init_params(key, n, n_mid, n_out):
    """Deterministic init mimicking torch.nn.Linear (uniform(-1/sqrt(fan_in), +))."""
    k1, k2, k3, k4 = jax.random.split(key, 4)
    lim1 = 1.0 / jnp.sqrt(n)
    lim2 = 1.0 / jnp.sqrt(n_mid)
    # torch Linear stores W as (out, in); we keep the (in, out) transpose for the kernel.
    w1 = jax.random.uniform(k1, (n, n_mid), jnp.float32, -lim1, lim1)
    b1 = jax.random.uniform(k2, (n_mid,), jnp.float32, -lim1, lim1)
    w2 = jax.random.uniform(k3, (n_mid, n_out), jnp.float32, -lim2, lim2)
    b2 = jax.random.uniform(k4, (n_out,), jnp.float32, -lim2, lim2)
    return w1, b1, w2, b2


if __name__ == "__main__":
    # Small shapes consistent with the module (n=2048, n_mid=1024, n_out=1 scaled down).
    # B=256 with auto tb=64 -> 4 grid steps (exercises pipelining / v7x megacore path).
    B, n, n_mid, n_out = 256, 256, 128, 1

    key = jax.random.PRNGKey(0)
    kx, kp = jax.random.split(key)
    x = jax.random.normal(kx, (B, n), jnp.float32)
    w1, b1, w2, b2 = init_params(kp, n, n_mid, n_out)

    params = prepare_params(w1, b1, w2, b2)   # one-time bf16 cast / reshapes
    y = nn_forward(x, params)
    y = jax.block_until_ready(y)

    # Reference in plain JAX, matching the kernel's numerics (bf16 MXU, f32 acc).
    xb = x.astype(jnp.bfloat16)
    w1b = w1.astype(jnp.bfloat16)
    h = jnp.dot(xb, w1b, preferred_element_type=jnp.float32) + b1
    h = jnp.where(h > 0, h, 0.01 * h)
    z = h @ w2 + b2
    y_ref = jax.nn.sigmoid(z)

    assert y.shape == (B, n_out)
    assert jnp.allclose(y, y_ref, atol=2e-3, rtol=2e-3), float(jnp.max(jnp.abs(y - y_ref)))

    print("KERNEL_OK")
</pallas_src>

<mosaic_0001>
module attributes {stable_mosaic.version = 11 : i64} {
  func.func @_nn_kernel(%arg0: i32, %arg1: memref<64x256xf32, #tpu.memory_space<vmem>>, %arg2: memref<256x128xbf16, #tpu.memory_space<vmem>>, %arg3: memref<1x128xf32, #tpu.memory_space<vmem>>, %arg4: memref<1x128xf32, #tpu.memory_space<vmem>>, %arg5: memref<1x1xf32, #tpu.memory_space<vmem>>, %arg6: memref<64x1xf32, #tpu.memory_space<vmem>>) attributes {dimension_semantics = [#tpu.dimension_semantics<parallel>], iteration_bounds = array<i64: 4>, scalar_prefetch = 0 : i64, scratch_operands = 0 : i64, tpu.core_type = #tpu.core_type<tc>, window_params = [{transform_indices = @transform_0, window_bounds = array<i64: 64, 256>}, {pipeline_mode = #tpu.pipeline_mode<synchronous>, transform_indices = @transform_1, window_bounds = array<i64: 256, 128>}, {pipeline_mode = #tpu.pipeline_mode<synchronous>, transform_indices = @transform_2, window_bounds = array<i64: 1, 128>}, {pipeline_mode = #tpu.pipeline_mode<synchronous>, transform_indices = @transform_3, window_bounds = array<i64: 1, 128>}, {pipeline_mode = #tpu.pipeline_mode<synchronous>, transform_indices = @transform_4, window_bounds = array<i64: 1, 1>}, {transform_indices = @transform_5, window_bounds = array<i64: 64, 1>}]} {
    %c0 = arith.constant 0 : index
    %c0_0 = arith.constant 0 : index
    %0 = vector.load %arg1[%c0, %c0_0] : memref<64x256xf32, #tpu.memory_space<vmem>>, vector<64x256xf32>
    %1 = arith.truncf %0 : vector<64x256xf32> to vector<64x256xbf16>
    %c0_1 = arith.constant 0 : index
    %c0_2 = arith.constant 0 : index
    %2 = vector.load %arg2[%c0_1, %c0_2] : memref<256x128xbf16, #tpu.memory_space<vmem>>, vector<256x128xbf16>
    %cst = arith.constant dense<0.000000e+00> : vector<64x128xf32>
    %3 = tpu.matmul %1, %2, %cst {dimension_numbers = #tpu.dot_dimension_numbers<[1], [0], [0], [1], [0, 0, 1, 1], [], []>} : vector<64x256xbf16>, vector<256x128xbf16>, vector<64x128xf32> -> vector<64x128xf32>
    %c0_3 = arith.constant 0 : index
    %c0_4 = arith.constant 0 : index
    %4 = vector.load %arg3[%c0_3, %c0_4] : memref<1x128xf32, #tpu.memory_space<vmem>>, vector<1x128xf32>
    %5 = vector.broadcast %4 : vector<1x128xf32> to vector<64x128xf32>
    %6 = arith.addf %3, %5 : vector<64x128xf32>
    %cst_5 = arith.constant 0.000000e+00 : f32
    %7 = vector.broadcast %cst_5 : f32 to vector<64x128xf32>
    %8 = arith.cmpf ogt, %6, %7 : vector<64x128xf32>
    %cst_6 = arith.constant 0.00999999977 : f32
    %9 = vector.broadcast %cst_6 : f32 to vector<64x128xf32>
    %10 = arith.mulf %9, %6 : vector<64x128xf32>
    %11 = arith.select %8, %6, %10 : vector<64x128xi1>, vector<64x128xf32>
    %c0_7 = arith.constant 0 : index
    %c0_8 = arith.constant 0 : index
    %12 = vector.load %arg4[%c0_7, %c0_8] : memref<1x128xf32, #tpu.memory_space<vmem>>, vector<1x128xf32>
    %13 = vector.broadcast %12 : vector<1x128xf32> to vector<64x128xf32>
    %14 = arith.mulf %11, %13 : vector<64x128xf32>
    %cst_9 = arith.constant dense<0.000000e+00> : vector<64xf32>
    %15 = vector.multi_reduction <add>, %14, %cst_9 [1] : vector<64x128xf32> to vector<64xf32>
    %16 = vector.shape_cast %15 : vector<64xf32> to vector<64x1xf32>
    %c0_10 = arith.constant 0 : index
    %c0_11 = arith.constant 0 : index
    %17 = vector.load %arg5[%c0_10, %c0_11] : memref<1x1xf32, #tpu.memory_space<vmem>>, vector<1x1xf32>
    %18 = vector.broadcast %17 : vector<1x1xf32> to vector<64x1xf32>
    %19 = arith.addf %16, %18 : vector<64x1xf32>
    %20 = math.absf %19 : vector<64x1xf32>
    %cst_12 = arith.constant 0.000000e+00 : f32
    %21 = vector.broadcast %cst_12 : f32 to vector<64x1xf32>
    %22 = arith.subf %21, %20 : vector<64x1xf32>
    %23 = math.exp %22 : vector<64x1xf32>
    %cst_13 = arith.constant 1.000000e+00 : f32
    %24 = vector.broadcast %cst_13 : f32 to vector<64x1xf32>
    %25 = arith.addf %24, %23 : vector<64x1xf32>
    %26 = tpu.reciprocal %25 {approx = true} : vector<64x1xf32> -> vector<64x1xf32>
    %cst_14 = arith.constant 0.000000e+00 : f32
    %27 = vector.broadcast %cst_14 : f32 to vector<64x1xf32>
    %28 = arith.cmpf oge, %19, %27 : vector<64x1xf32>
    %cst_15 = arith.constant 1.000000e+00 : f32
    %29 = vector.broadcast %cst_15 : f32 to vector<64x1xf32>
    %30 = arith.select %28, %29, %23 : vector<64x1xi1>, vector<64x1xf32>
    %31 = arith.mulf %30, %26 : vector<64x1xf32>
    %c0_16 = arith.constant 0 : index
    %c0_17 = arith.constant 0 : index
    %32 = vector.load %arg6[%c0_16, %c0_17] : memref<64x1xf32, #tpu.memory_space<vmem>>, vector<64x1xf32>
    tpu.vector_store %arg6[%c0_16, %c0_17], %31 {strides = array<i32>} : memref<64x1xf32, #tpu.memory_space<vmem>>, vector<64x1xf32>,
    return
  }
  func.func @transform_0(%arg0: i32) -> (i32, i32) {
    %c0_i32 = arith.constant 0 : i32
    %c0_i32_0 = arith.constant 0 : i32
    return %arg0, %c0_i32 : i32, i32
  }
  func.func @transform_1(%arg0: i32) -> (i32, i32) {
    %c0_i32 = arith.constant 0 : i32
    %c0_i32_0 = arith.constant 0 : i32
    %c0_i32_1 = arith.constant 0 : i32
    return %c0_i32, %c0_i32_0 : i32, i32
  }
  func.func @transform_2(%arg0: i32) -> (i32, i32) {
    %c0_i32 = arith.constant 0 : i32
    %c0_i32_0 = arith.constant 0 : i32
    %c0_i32_1 = arith.constant 0 : i32
    return %c0_i32, %c0_i32_0 : i32, i32
  }
  func.func @transform_3(%arg0: i32) -> (i32, i32) {
    %c0_i32 = arith.constant 0 : i32
    %c0_i32_0 = arith.constant 0 : i32
    %c0_i32_1 = arith.constant 0 : i32
    return %c0_i32, %c0_i32_0 : i32, i32
  }
  func.func @transform_4(%arg0: i32) -> (i32, i32) {
    %c0_i32 = arith.constant 0 : i32
    %c0_i32_0 = arith.constant 0 : i32
    %c0_i32_1 = arith.constant 0 : i32
    return %c0_i32, %c0_i32_0 : i32, i32
  }
  func.func @transform_5(%arg0: i32) -> (i32, i32) {
    %c0_i32 = arith.constant 0 : i32
    %c0_i32_0 = arith.constant 0 : i32
    return %arg0, %c0_i32 : i32, i32
  }
}

</mosaic_0001>

<bundles_post_ra>
// kernel: tpu_custom_call.1
= control target key start
LH: loop header
LB: loop body
LE: loop exit
PB: predicated region body
PF: predicated region fallthrough
CT: control target
= control target key end

     0   :  { %s1249_s0 = inlined_call_operand.hbm [shape: f32[256,256], index: 0, kind: input, shape index: {}]   ;;  %s1250_s1 = inlined_call_operand.hbm [shape: bf16[256,128], index: 1, kind: input, shape index: {}]   ;;  %s1251_s2 = inlined_call_operand.vmem [shape: f32[1,128], index: 2, kind: input, shape index: {}]   ;;  %s1252_s3 = inlined_call_operand.vmem [shape: f32[1,128], index: 3, kind: input, shape index: {}]   ;;  %s1253_s4 = inlined_call_operand.<no memory space> [shape: f32[1,1], index: 4, kind: input, shape index: {}]   ;;  %s1254_s5 = inlined_call_operand.vmem [shape: f32[256,1], index: 5, kind: output, shape index: {}]  }
   0x1   :  { %v10_v0 = vstv %s1253_s4 }
   0x2   :  { %11 = vst [vmem:[#allocation2] sm:$0x1] %v10_v0 }
   0x3   :  { %12 = vsyncpa [#allocation4], 0 }
   0x4   :  { %14 = vsyncpa [#allocation4 + $0x1], 0 }
   0x5   :  { %15 = vsyncpa [#allocation6], 0  ;;  %s1046_s20 = smov 0   ;;  %s1048_s21 = smov 0  }
   0x6   :  { %s1050_s22 = smov 0   ;;  %s1052_s23 = smov 0  }
   0x7 LB: > { %s718_s4 = sadd.s32 4294967295, %s1005_s23   ;;  %p41_p0 = scmp.ne.s32.totalorder %s997_s21, %s993_s20  ;;  %s1005_s23 = sphi %s1052_s23, %s1270_s23   ;;  %s1001_s22 = sphi %s1050_s22, %s1269_s22   ;;  %s997_s21 = sphi %s1048_s21, %s1268_s21   ;;  %s993_s20 = sphi %s1046_s20, %s1267_s20  }
   0x8   : > { %p1068_p1 = scmp.eq.s32.totalorder %s718_s4, 0  ;;  %p720_p2 = scmp.ge.s32.totalorder %s1005_s23, 1 }
   0x9   : > { %p162_p3 = scmp.lt.s32.totalorder %s1005_s23, 5  ;;  %s1007_s27 = smov [#allocation5]  }
   0xa   : > { %s1259_s24 = scalar_select %p1068_p1, 1, 0 }
   0xb   : > { %p1076_p4 = por %p1068_p1, %p41_p0  ;;  %p1080_p5 = pnand %p720_p2, %p162_p3 }
   0xc   : > { %s174_s28 = sshll.u32 %s1007_s27, 4  ;;  %s1093_s30 = sadd.s32 1, %s1005_s23   ;;  %s175_s28 = int_to_ptr.vmem [resolvable:$true] %s174_s28 }
   0xd   : > { %s1260_s25 = scalar_select %p1076_p4, 1, 0 }
   0xe   : > { %s1261_s26 = scalar_select %p1080_p5, 1, 0 }
   0xf   : > { %p817_p6 = pneg %p1080_p5  ;;  %s28_s6 = sadd.s32 1, %s1001_s22 }
  0x10   : > { %s25_s7 = ssub.s32 %s1005_s23, %s1093_s30  ;;  %s924_s8 = scalar_lea.vmem %s175_s28, 2048 }
  0x11   : > { %p1088_p7 = pnand %p817_p6, %p1068_p1  ;;  %p925_p9 = scmp.ne.s32.totalorder %s175_s28, %s924_s8 }
  0x12   : > { %p932_p12 = scmp.lt.s32.totalorder %s175_s28, %s175_s28  ;;  %p933_p13 = scmp.lt.s32.totalorder %s924_s8, %s924_s8 }
  0x13   : > { %p915_p8 = pneg %p1088_p7 }
  0x14   : > { %p934_p0 = por %p933_p13, %p932_p12 }
  0x15   : > { %p927_p10 = pnand %p925_p9, %p915_p8 }
  0x17   : > { %p928_p11 = pneg %p927_p10 }
  0x19   : > { %p935_p2 = pnand %p934_p0, %p928_p11 }
  0x1b   : > { %938 = shalt.err (!%p935_p2)
}
  0x1c   : > { %s1008_s9 = smov 64   ;;  %s1009_s10 = smov 4  }
  0x1d   : > { %820 = dma.hbm_to_vmem [thread:$0]  (!%p1088_p7), %s1250_s1, 2048, %s175_s28, [#allocation6], %s1008_s9, %s1008_s9, %s1009_s10  }
  0x1e   : > { %p26_p3 = scmp.eq.s32.totalorder %s25_s7, 0  ;;  %p35_p6 = scmp.ne.s32.totalorder %s1001_s22, %s997_s21 }
  0x1f   : > { %p36_p8 = scmp.eq.s32.totalorder %s1005_s23, 0  ;;  %p826_p9 = scmp.lt.s32.totalorder %s1005_s23, 4 }
  0x20   : > { %s1110_s13 = scalar_select %p26_p3, %s1001_s22, %s28_s6  }
  0x21   : > { %p37_p10 = por %p36_p8, %p35_p6  ;;  %s197_s14 = sand.u32 1, %s1001_s22  }
  0x22   : > { %s723_s15 = sshll.u32 %s197_s14, 7  ;;  %s754_s16 = sshll.u32 %s1005_s23, 11 }
  0x23   : > { %s1117_s19 = scalar_lea.hbm %s1249_s0, %s754_s16  ;;  %s201_s20 = scalar_lea.vmem [#allocation3], %s723_s15 }
  0x24   : > { %s209_s27 = sshll.u32 %s201_s20, 4  ;;  %p1121_p7 = pnand %p826_p9, %p37_p10  ;;  %s1119_s27 = int_to_ptr.vmem [resolvable:$true] %s209_s27 }
  0x25   : > { %s1125_s29 = scalar_lea.sflag [#allocation4], %s197_s14  ;;  %s939_s6 = scalar_lea.hbm %s1117_s19, 2048 }
  0x26   : > { %p940_p11 = scmp.ne.s32.totalorder %s1117_s19, %s939_s6  ;;  %p941_p12 = pneg %p1121_p7 }
  0x27   : > { %s944_s9 = scalar_lea.hbm %s1249_s0, 8192  ;;  %p945_p2 = scmp.lt.s32.totalorder %s1117_s19, %s1249_s0 }
  0x28   : > { %p942_p13 = pnand %p941_p12, %p940_p11  ;;  %p946_p3 = scmp.lt.s32.totalorder %s944_s9, %s939_s6 }
  0x2a   : > { %p943_p0 = pneg %p942_p13  ;;  %p947_p6 = por %p946_p3, %p945_p2 }
  0x2c   : > { %p948_p8 = pnand %p947_p6, %p943_p0 }
  0x2e   : > { %951 = shalt.err (!%p948_p8)
}
  0x2f   : > { %s952_s12 = scalar_lea.vmem %s1119_s27, 2048  ;;  %s1010_s14 = smov [#allocation3]  }
  0x30   : > { %p953_p9 = scmp.ne.s32.totalorder %s1119_s27, %s952_s12  ;;  %s957_s15 = sshll.u32 %s1010_s14, 4  ;;  %s958_s15 = int_to_ptr.vmem [resolvable:$false] %s957_s15 }
  0x31   : > { %s959_s16 = scalar_lea.vmem %s958_s15, 4096  ;;  %p960_p13 = scmp.lt.s32.totalorder %s1119_s27, %s958_s15 }
  0x32   : > { %p955_p10 = pnand %p953_p9, %p941_p12  ;;  %p961_p1 = scmp.lt.s32.totalorder %s959_s16, %s952_s12 }
  0x34   : > { %p956_p11 = pneg %p955_p10  ;;  %p962_p4 = por %p961_p1, %p960_p13 }
  0x36   : > { %p963_p5 = pnand %p962_p4, %p956_p11 }
  0x38   : > { %966 = shalt.err (!%p963_p5)
}
  0x39   : > { %s1011_s17 = smov 256   ;;  %s1012_s18 = smov 16  }
  0x3a   : > { %824 = dma.hbm_to_vmem [thread:$0]  (!%p1121_p7), %s1117_s19, 2048, %s1119_s27, %s1125_s29, %s1011_s17, %s1011_s17, %s1012_s18  }
  0x3b   : > { %p1264_p12 = scmp.ne.s32.totalorder %s1261_s26, 0 }
  0x3c   : > { %s223_s20 = sand.u32 (!%p1264_p12), 1, %s997_s21   ;;  %p1265_p1 = scmp.ne.s32.totalorder (!%p1264_p12), %s1260_s25, 0 }
  0x3d   : > { %221 = sbr.rel (%p1264_p12) target bundleno = 503 (0x1f7), region = 40  ;;  %s728_s6 = sshll.u32 (!%p1264_p12), %s223_s20, 7 }
  0x3e   : > { %s224_s7 = scalar_lea.sflag (!%p1264_p12), [#allocation4], %s223_s20  ;;  %s1149_s8 = scalar_lea.vmem (!%p1264_p12), [#allocation3], %s728_s6 }
  0x42   : > { %984 = dma.done.wait (%p1265_p1), %s224_s7, 2048  }
  0x43   : > { %986 = vsyncadd (%p1265_p1), %s224_s7, 4294965248  ;;  %p1266_p4 = scmp.ne.s32.totalorder %s1259_s24, 0 }
  0x45   : > { %988 = dma.done.wait (%p1266_p4), [#allocation6], 2048  }
  0x46   : > { %990 = vsyncadd (%p1266_p4), [#allocation6], 4294965248  ;;  %v865_v1 = vld [vmem:[#allocation5 + $0x78] sm:$0xff]   ;;  %v867_v3 = vld [vmem:[#allocation5 + $0x70] sm:$0xff]   ;;  %s730_s27 = sshll.u32 %s718_s4, 3  ;;  %vm632_vm9 = vcmask 7168  }
  0x47   : > { %v866_v2 = vld [vmem:[#allocation5 + $0x38] sm:$0xff]   ;;  %755 = vmatprep.subr.bf16.mxu0 %v865_v1  ;;  %795 = vmatprep.subr.bf16.mxu1 %v865_v1  ;;  %v868_v4 = vld [vmem:[#allocation5 + $0x30] sm:$0xff]   ;;  %v869_v5 = vld [vmem:[#allocation5 + $0x68] sm:$0xff]   ;;  %p260_p5 = scmp.lt.s32.totalorder %s730_s27, 31 }
  0x48   : > { %756 = vmatpush3.bf16.msra.mxu0 %v866_v2  ;;  %803 = vmatpush3.bf16.msra.mxu1 %v866_v2  ;;  %v870_v6 = vld [vmem:[#allocation5 + $0x28] sm:$0xff]   ;;  %v871_v7 = vld [vmem:[#allocation5 + $0x60] sm:$0xff]   ;;  %v873_v9 = vld [vmem:[#allocation5 + $0x58] sm:$0xff]  }
  0x49   : > { %757 = vmatprep.subr.bf16.mxu0 %v867_v3  ;;  %796 = vmatprep.subr.bf16.mxu1 %v867_v3  ;;  %v872_v8 = vld [vmem:[#allocation5 + $0x20] sm:$0xff]   ;;  %v874_v10 = vld [vmem:[#allocation5 + $0x18] sm:$0xff]   ;;  %v875_v11 = vld [vmem:[#allocation5 + $0x50] sm:$0xff]   ;;  %s1272_s27 = smov (!%p260_p5, %s730_s27), 31 }
  0x4a   : > { %v267_v12 = vld [vmem:[%s1149_s8 + $0x8] sm:$0xff]  ;;  %v269_v13 = vld [vmem:[%s1149_s8 + $0x18] sm:$0xff]  ;;  %v876_v18 = vld [vmem:[#allocation5 + $0x10] sm:$0xff]   ;;  %s731_s23 = sshll.u32 %s1272_s27, 3 }
  0x4b   : > { %v275_v14 = vld [vmem:[%s1149_s8 + $0x48] sm:$0xff]  ;;  %v283_v15 = vpack.c.bf16 %v269_v13, %v267_v12  ;;  %v277_v16 = vld [vmem:[%s1149_s8 + $0x58] sm:$0xff]  ;;  %v879_v21 = vld [vmem:[#allocation5 + $0x40] sm:$0xff]   ;;  %s1211_s29 = scalar_lea.vmem %s1254_s5, %s731_s23 }
  0x4c   : > { %758 = vmatpush3.bf16.msra.mxu0 %v868_v4  ;;  %804 = vmatpush3.bf16.msra.mxu1 %v868_v4  ;;  %v287_v17 = vpack.c.bf16 %v277_v16, %v275_v14  ;;  %v877_v19 = vld [vmem:[#allocation5 + $0x48] sm:$0xff]   ;;  %v880_v22 = vld [vmem:[#allocation5] sm:$0xff]   ;;  %v268_v24 = vld [vmem:[%s1149_s8 + $0x10] sm:$0xff] }
  0x4d   : > { %759 = vmatprep.subr.bf16.mxu0 %v869_v5  ;;  %797 = vmatprep.subr.bf16.mxu1 %v869_v5  ;;  %v878_v20 = vld [vmem:[#allocation5 + $0x8] sm:$0xff]   ;;  %v266_v23 = vld [vmem:[%s1149_s8] sm:$0xff]  ;;  %v276_v26 = vld [vmem:[%s1149_s8 + $0x50] sm:$0xff] }
  0x4e   : > { %457 = vmatprep.mubr.bf16.mxu0 %v283_v15  ;;  %473 = vmatprep.mubr.bf16.mxu1 %v287_v17  ;;  %v274_v25 = vld [vmem:[%s1149_s8 + $0x40] sm:$0xff]  ;;  %v271_v27 = vld [vmem:[%s1149_s8 + $0x28] sm:$0xff]  ;;  %v273_v28 = vld [vmem:[%s1149_s8 + $0x38] sm:$0xff]  ;;  %v282_v31 = vpack.c.bf16 %v268_v24, %v266_v23 }
  0x4f   : > { %v279_v29 = vld [vmem:[%s1149_s8 + $0x68] sm:$0xff]  ;;  %v281_v30 = vld [vmem:[%s1149_s8 + $0x78] sm:$0xff]  ;;  %v286_v32 = vpack.c.bf16 %v276_v26, %v274_v25  ;;  %v285_v33 = vpack.c.bf16 %v273_v28, %v271_v27  ;;  %v270_v35 = vld [vmem:[%s1149_s8 + $0x20] sm:$0xff] }
  0x50   : > { %760 = vmatpush3.bf16.msra.mxu0 %v870_v6  ;;  %805 = vmatpush3.bf16.msra.mxu1 %v870_v6  ;;  %v289_v34 = vpack.c.bf16 %v281_v30, %v279_v29  ;;  %v272_v36 = vld [vmem:[%s1149_s8 + $0x30] sm:$0xff]  ;;  %v278_v37 = vld [vmem:[%s1149_s8 + $0x60] sm:$0xff]  ;;  %v732_v43 = vld [vmem:[%s1251_s2] ss:$0 sm:$0xff] }
  0x51   : > { %761 = vmatprep.subr.bf16.mxu0 %v871_v7  ;;  %798 = vmatprep.subr.bf16.mxu1 %v871_v7  ;;  %v280_v38 = vld [vmem:[%s1149_s8 + $0x70] sm:$0xff]  ;;  %v284_v39 = vpack.c.bf16 %v272_v36, %v270_v35  ;;  %v749_v57 = vld [vmem:[%s1252_s3] ss:$0 sm:$0xff] }
  0x52   : > { %v288_v40 = vpack.c.bf16 %v280_v38, %v278_v37  ;;  %v750_v35 = vld [vmem:[#allocation2] ss:$0 sm:$0xff] }
  0x54   : > { %762 = vmatpush3.bf16.msra.mxu0 %v872_v8  ;;  %806 = vmatpush3.bf16.msra.mxu1 %v872_v8 }
  0x55   : > { %763 = vmatprep.subr.bf16.mxu0 %v873_v9  ;;  %799 = vmatprep.subr.bf16.mxu1 %v873_v9 }
  0x58   : > { %764 = vmatpush3.bf16.msra.mxu0 %v874_v10  ;;  %807 = vmatpush3.bf16.msra.mxu1 %v874_v10 }
  0x59   : > { %765 = vmatprep.subr.bf16.mxu0 %v875_v11  ;;  %800 = vmatprep.subr.bf16.mxu1 %v875_v11 }
  0x5c   : > { %766 = vmatpush3.bf16.msra.mxu0 %v876_v18  ;;  %808 = vmatpush3.bf16.msra.mxu1 %v876_v18 }
  0x5d   : > { %767 = vmatprep.subr.bf16.mxu0 %v877_v19  ;;  %801 = vmatprep.subr.bf16.mxu1 %v877_v19 }
  0x60   : > { %768 = vmatpush3.bf16.msra.mxu0 %v878_v20  ;;  %809 = vmatpush3.bf16.msra.mxu1 %v878_v20 }
  0x61   : > { %769 = vmatprep.subr.bf16.mxu0 %v879_v21  ;;  %802 = vmatprep.subr.bf16.mxu1 %v879_v21 }
  0x64   : > { %770 = vmatpush3.bf16.msra.mxu0 %v880_v22  ;;  %810 = vmatpush3.bf16.msra.mxu1 %v880_v22 }
  0x67   : > { %458 = vmatmul.mubr.bf16.vlgmr.msra.gmra.mxu0 %v282_v31  ;;  %474 = vmatmul.mubr.bf16.vlgmr.msra.gmra.mxu1 %v286_v32 }
  0x68   : > { %465 = vmatprep.mubr.bf16.mxu0 %v285_v33  ;;  %481 = vmatprep.mubr.bf16.mxu1 %v289_v34 }
  0x6f   : > { %466 = vmatmul.mubr.bf16.gmra.mxu0 %v284_v39  ;;  %482 = vmatmul.mubr.bf16.gmra.mxu1 %v288_v40 }
 0x127   : > { %v771_v41 = vpop.f32.mrf.mxu0  ;;  %v783_v42 = vpop.f32.mrf.mxu1 }
 0x129   : > { %v772_v44 = vpop.f32.mrf.mxu0  ;;  %v784_v45 = vpop.f32.mrf.mxu1 }
 0x12a   : > { %v773_v46 = vadd.f32 %v772_v44, %v771_v41  ;;  %v785_v47 = vadd.f32 %v784_v45, %v783_v42 }
 0x12b   : > { %v774_v48 = vpop.f32.mrf.mxu0  ;;  %v786_v49 = vpop.f32.mrf.mxu1 }
 0x12c   : > { %v460_v50 = vadd.f32 %v773_v46, %v732_v43  ;;  %v476_v51 = vadd.f32 %v785_v47, %v732_v43 }
 0x12d   : > { %v775_v52 = vpop.f32.mrf.mxu0  ;;  %v787_v53 = vpop.f32.mrf.mxu1 }
 0x12e   : > { %v776_v54 = vadd.f32 %v775_v52, %v774_v48  ;;  %v788_v55 = vadd.f32 %v787_v53, %v786_v49  ;;  %vm490_vm0 = vcmp.gt.f32.partialorder %v460_v50, 0.0  ;;  %v498_v56 = vmul.f32 0.01, %v460_v50 }
 0x12f   : > { %v777_v58 = vpop.f32.mrf.mxu0  ;;  %v789_v59 = vpop.f32.mrf.mxu1  ;;  %vm494_vm1 = vcmp.gt.f32.partialorder %v476_v51, 0.0  ;;  %v502_v60 = vmul.f32 0.01, %v476_v51 }
 0x130   : > { %v463_v61 = vadd.f32 %v776_v54, %v732_v43  ;;  %v479_v62 = vadd.f32 %v788_v55, %v732_v43  ;;  %v506_v63 = vsel %vm490_vm0, %v460_v50, %v498_v56 }
 0x131   : > { %v778_v0 = vpop.f32.mrf.mxu0  ;;  %v790_v1 = vpop.f32.mrf.mxu1  ;;  %v521_v2 = vmul.f32 %v749_v57, %v506_v63  ;;  %v510_v3 = vsel %vm494_vm1, %v476_v51, %v502_v60 }
 0x132   : > { %v779_v4 = vadd.f32 %v778_v0, %v777_v58  ;;  %v791_v5 = vadd.f32 %v790_v1, %v789_v59  ;;  %vm495_vm2 = vcmp.gt.f32.partialorder %v479_v62, 0.0  ;;  %v503_v6 = vmul.f32 0.01, %v479_v62 }
 0x133   : > { %v780_v7 = vpop.f32.mrf.mxu0  ;;  %v792_v8 = vpop.f32.mrf.mxu1  ;;  %529 = vadd.xlane.f32.xlu0 %v521_v2  ;;  %vm491_vm3 = vcmp.gt.f32.partialorder %v463_v61, 0.0  ;;  %v499_v9 = vmul.f32 0.01, %v463_v61  ;;  %v525_v16 = vmul.f32 %v749_v57, %v510_v3 }
 0x134   : > { %v468_v10 = vadd.f32 %v779_v4, %v732_v43  ;;  %v484_v11 = vadd.f32 %v791_v5, %v732_v43  ;;  %v511_v12 = vsel %vm495_vm2, %v479_v62, %v503_v6 }
 0x135   : > { %v781_v13 = vpop.f32.mrf.mxu0  ;;  %v793_v14 = vpop.f32.mrf.mxu1  ;;  %v526_v15 = vmul.f32 %v749_v57, %v511_v12  ;;  %v507_v17 = vsel %vm491_vm3, %v463_v61, %v499_v9 }
 0x136   : > { %v782_v18 = vadd.f32 %v781_v13, %v780_v7  ;;  %v794_v19 = vadd.f32 %v793_v14, %v792_v8  ;;  %vm492_vm4 = vcmp.gt.f32.partialorder %v468_v10, 0.0  ;;  %v500_v20 = vmul.f32 0.01, %v468_v10 }
 0x137   : > { %539 = vadd.xlane.f32.xlu1 %v526_v15  ;;  %537 = vadd.xlane.f32.xlu0 %v525_v16  ;;  %vm496_vm5 = vcmp.gt.f32.partialorder %v484_v11, 0.0  ;;  %v504_v21 = vmul.f32 0.01, %v484_v11  ;;  %v522_v26 = vmul.f32 %v749_v57, %v507_v17 }
 0x138   : > { %v471_v22 = vadd.f32 %v782_v18, %v732_v43  ;;  %v487_v23 = vadd.f32 %v794_v19, %v732_v43  ;;  %v508_v24 = vsel %vm492_vm4, %v468_v10, %v500_v20 }
 0x139   : > { %v523_v25 = vmul.f32 %v749_v57, %v508_v24  ;;  %v512_v28 = vsel %vm496_vm5, %v484_v11, %v504_v21 }
 0x13a   : > { %vm493_vm6 = vcmp.gt.f32.partialorder %v471_v22, 0.0  ;;  %v501_v27 = vmul.f32 0.01, %v471_v22  ;;  %vm497_vm7 = vcmp.gt.f32.partialorder %v487_v23, 0.0  ;;  %v505_v29 = vmul.f32 0.01, %v487_v23 }
 0x13b   : > { %533 = vadd.xlane.f32.xlu1 %v523_v25  ;;  %531 = vadd.xlane.f32.xlu0 %v522_v26  ;;  %v527_v32 = vmul.f32 %v749_v57, %v512_v28 }
 0x13c   : > { %v509_v30 = vsel %vm493_vm6, %v471_v22, %v501_v27  ;;  %v513_v33 = vsel %vm497_vm7, %v487_v23, %v505_v29 }
 0x13d   : > { %v524_v31 = vmul.f32 %v749_v57, %v509_v30  ;;  %v528_v34 = vmul.f32 %v749_v57, %v513_v33 }
 0x13f   : > { %535 = vadd.xlane.f32.xlu1 %v524_v31  ;;  %541 = vadd.xlane.f32.xlu0 %v527_v32 }
 0x143   : > { %543 = vadd.xlane.f32.xlu1 %v528_v34 }
 0x1bc   : > { %v530_v36 = vpop.xlane.xlu0 %529 }
 0x1bd   : > { %v1181_v37 = vadd.f32 %v750_v35, %v530_v36 }
 0x1bf   : > { %v560_v38 = vand.u32 2147483647, %v1181_v37  ;;  %vm608_vm8 = vcmp.ge.f32.partialorder %v1181_v37, 0.0 }
 0x1c0   : > { %v540_v39 = vpop.xlane.xlu1 %539  ;;  %v538_v40 = vpop.xlane.xlu0 %537 }
 0x1c1   : > { %v568_v41 = vsub.f32 0.0, %v560_v38  ;;  %v1184_v42 = vadd.f32 %v750_v35, %v540_v39  ;;  %v1186_v43 = vadd.f32 %v750_v35, %v538_v40 }
 0x1c3   : > { %v576_v44 = vmul.f32 1.442695, %v568_v41  ;;  %v565_v45 = vand.u32 2147483647, %v1184_v42  ;;  %v564_v46 = vand.u32 2147483647, %v1186_v43 }
 0x1c4   : > { %v534_v47 = vpop.xlane.xlu1 %533  ;;  %v532_v48 = vpop.xlane.xlu0 %531  ;;  %vm613_vm10 = vcmp.ge.f32.partialorder %v1184_v42, 0.0  ;;  %vm612_vm11 = vcmp.ge.f32.partialorder %v1186_v43, 0.0 }
 0x1c5   : > { %881 = vpow2.f32 %v576_v44  ;;  %v573_v49 = vsub.f32 0.0, %v565_v45  ;;  %v1190_v50 = vadd.f32 %v750_v35, %v534_v47  ;;  %v1192_v51 = vadd.f32 %v750_v35, %v532_v48 }
 0x1c6   : > { %v572_v52 = vsub.f32 0.0, %v564_v46 }
 0x1c7   : > { %v586_v53 = vmul.f32 1.442695, %v573_v49  ;;  %v562_v54 = vand.u32 2147483647, %v1190_v50  ;;  %v561_v56 = vand.u32 2147483647, %v1192_v51 }
 0x1c8   : > { %v584_v55 = vmul.f32 1.442695, %v572_v52  ;;  %v536_v57 = vpop.xlane.xlu1 %535  ;;  %v542_v58 = vpop.xlane.xlu0 %541  ;;  %vm610_vm12 = vcmp.ge.f32.partialorder %v1190_v50, 0.0  ;;  %vm609_vm13 = vcmp.ge.f32.partialorder %v1192_v51, 0.0 }
 0x1c9   : > { %883 = vpow2.f32 %v586_v53  ;;  %v570_v59 = vsub.f32 0.0, %v562_v54  ;;  %v1196_v60 = vadd.f32 %v750_v35, %v536_v57  ;;  %v1198_v61 = vadd.f32 %v750_v35, %v542_v58 }
 0x1ca   : > { %885 = vpow2.f32 %v584_v55  ;;  %v569_v62 = vsub.f32 0.0, %v561_v56 }
 0x1cb   : > { %v580_v63 = vmul.f32 1.442695, %v570_v59  ;;  %v563_v0 = vand.u32 2147483647, %v1196_v60  ;;  %v566_v2 = vand.u32 2147483647, %v1198_v61 }
 0x1cc   : > { %v578_v1 = vmul.f32 1.442695, %v569_v62  ;;  %v544_v3 = vpop.xlane.xlu1 %543  ;;  %vm611_vm14 = vcmp.ge.f32.partialorder %v1196_v60, 0.0  ;;  %vm614_vm15 = vcmp.ge.f32.partialorder %v1198_v61, 0.0 }
 0x1cd   : > { %887 = vpow2.f32 %v580_v63  ;;  %v571_v4 = vsub.f32 0.0, %v563_v0  ;;  %v1202_v5 = vadd.f32 %v750_v35, %v544_v3  ;;  %v574_v6 = vsub.f32 0.0, %v566_v2 }
 0x1ce   : > { %889 = vpow2.f32 %v578_v1 }
 0x1cf   : > { %v582_v7 = vmul.f32 1.442695, %v571_v4  ;;  %v567_v8 = vand.u32 2147483647, %v1202_v5  ;;  %v588_v9 = vmul.f32 1.442695, %v574_v6 }
 0x1d0   : > { %vm615_vm0 = vcmp.ge.f32.partialorder %v1202_v5, 0.0 }
 0x1d1   : > { %891 = vpow2.f32 %v582_v7  ;;  %v575_v10 = vsub.f32 0.0, %v567_v8 }
 0x1d2   : > { %v882_v11 = vpop.eup %881  ;;  %893 = vpow2.f32 %v588_v9 }
 0x1d3   : > { %v592_v12 = vadd.f32 1.0, %v882_v11  ;;  %v590_v13 = vmul.f32 1.442695, %v575_v10  ;;  %v616_v27 = vsel %vm608_vm8, 1.0, %v882_v11 }
 0x1d5   : > { %895 = vrcp.f32 %v592_v12 }
 0x1d6   : > { %v884_v14 = vpop.eup %883  ;;  %897 = vpow2.f32 %v590_v13 }
 0x1d7   : > { %v886_v15 = vpop.eup %885  ;;  %v597_v16 = vadd.f32 1.0, %v884_v14  ;;  %v621_v32 = vsel %vm613_vm10, 1.0, %v884_v14 }
 0x1d8   : > { %v596_v17 = vadd.f32 1.0, %v886_v15  ;;  %v620_v35 = vsel %vm612_vm11, 1.0, %v886_v15 }
 0x1d9   : > { %899 = vrcp.f32 %v597_v16 }
 0x1da   : > { %v888_v18 = vpop.eup %887  ;;  %901 = vrcp.f32 %v596_v17 }
 0x1db   : > { %v890_v19 = vpop.eup %889  ;;  %v594_v20 = vadd.f32 1.0, %v888_v18  ;;  %v618_v38 = vsel %vm610_vm12, 1.0, %v888_v18 }
 0x1dc   : > { %v593_v21 = vadd.f32 1.0, %v890_v19  ;;  %v617_v41 = vsel %vm609_vm13, 1.0, %v890_v19 }
 0x1dd   : > { %903 = vrcp.f32 %v594_v20 }
 0x1de   : > { %v892_v22 = vpop.eup %891  ;;  %905 = vrcp.f32 %v593_v21 }
 0x1df   : > { %v894_v23 = vpop.eup %893  ;;  %v595_v24 = vadd.f32 1.0, %v892_v22  ;;  %v619_v44 = vsel %vm611_vm14, 1.0, %v892_v22 }
 0x1e0   : > { %v598_v25 = vadd.f32 1.0, %v894_v23  ;;  %v622_v47 = vsel %vm614_vm15, 1.0, %v894_v23 }
 0x1e1   : > { %907 = vrcp.f32 %v595_v24 }
 0x1e2   : > { %v896_v26 = vpop.eup %895  ;;  %909 = vrcp.f32 %v598_v25 }
 0x1e3   : > { %v898_v28 = vpop.eup %897  ;;  %v624_v29 = vmul.f32 %v896_v26, %v616_v27 }
 0x1e4   : > { %v599_v30 = vadd.f32 1.0, %v898_v28  ;;  %v623_v50 = vsel %vm615_vm0, 1.0, %v898_v28 }
 0x1e5   : > { %633 = vst.msk [vmem:[%s1211_s29] sm:$0xff] %vm632_vm9, %v624_v29 }
 0x1e6   : > { %v900_v31 = vpop.eup %899  ;;  %911 = vrcp.f32 %v599_v30 }
 0x1e7   : > { %v902_v33 = vpop.eup %901  ;;  %v629_v34 = vmul.f32 %v900_v31, %v621_v32 }
 0x1e8   : > { %v628_v36 = vmul.f32 %v902_v33, %v620_v35 }
 0x1e9   : > { %638 = vst.msk [vmem:[%s1211_s29 + $0x28] sm:$0xff] %vm632_vm9, %v629_v34 }
 0x1ea   : > { %v904_v37 = vpop.eup %903  ;;  %637 = vst.msk [vmem:[%s1211_s29 + $0x20] sm:$0xff] %vm632_vm9, %v628_v36 }
 0x1eb   : > { %v906_v39 = vpop.eup %905  ;;  %v626_v40 = vmul.f32 %v904_v37, %v618_v38 }
 0x1ec   : > { %v625_v42 = vmul.f32 %v906_v39, %v617_v41 }
 0x1ed   : > { %635 = vst.msk [vmem:[%s1211_s29 + $0x10] sm:$0xff] %vm632_vm9, %v626_v40 }
 0x1ee   : > { %v908_v43 = vpop.eup %907  ;;  %634 = vst.msk [vmem:[%s1211_s29 + $0x8] sm:$0xff] %vm632_vm9, %v625_v42 }
 0x1ef   : > { %v910_v45 = vpop.eup %909  ;;  %v627_v46 = vmul.f32 %v908_v43, %v619_v44 }
 0x1f0   : > { %v630_v48 = vmul.f32 %v910_v45, %v622_v47 }
 0x1f1   : > { %636 = vst.msk [vmem:[%s1211_s29 + $0x18] sm:$0xff] %vm632_vm9, %v627_v46 }
 0x1f2   : > { %639 = vst.msk [vmem:[%s1211_s29 + $0x30] sm:$0xff] %vm632_vm9, %v630_v48 }
 0x1f3   : > { %v912_v49 = vpop.eup %911 }
 0x1f4   : > { %v631_v51 = vmul.f32 %v912_v49, %v623_v50 }
 0x1f6   : > { %640 = vst.msk [vmem:[%s1211_s29 + $0x38] sm:$0xff] %vm632_vm9, %v631_v51 }
 0x1f7 PF: > { %p18_p7 = scmp.ge.s32.totalorder %s1093_s30, 6   ;;  %s1267_s20 = smov %s997_s21 }
 0x1f8   : > { %s1268_s21 = smov %s1001_s22  ;;  %s1269_s22 = smov %s1110_s13 }
 0x1f9   : > { %s1270_s23 = smov %s1093_s30  ;;  %20 = sbr.rel (!%p18_p7) target bundleno = 7 (0x7), region = 84 }
 0x1fe   :  { %663 = vsyncpa [#allocation4], 1 }
 0x1ff   :  { %665 = vsyncpa [#allocation4 + $0x1], 1 }
 0x200   :  { %666 = vsyncpa [#allocation6], 1 }

</bundles_post_ra>
